<compile_context>
chip_gen: v7x
topology: tpu7x:2x2x1
jax: 0.10.0
libtpu: 0.0.40
codegen_flags: <defaults>
</compile_context>

<pallas_src>
import jax
import jax.numpy as jnp
from jax.experimental import pallas as pl
from jax.experimental.pallas import tpu as pltpu

_LANE = 128   # lane width (last-dim alignment)
_SUBLANE = 8  # f32 sublane count (second-to-last-dim alignment)


def _round_up(n, m):
    return ((n + m - 1) // m) * m


# --------------------------------------------------------------------------- #
# Kernel
# --------------------------------------------------------------------------- #
def rnncell_kernel(x_ref, h_ref, wih_ref, whh_ref, b_ref, out_ref):
    """One RNNCell step on a (TB, TN) output tile.

    Two MXU dots (input->hidden, hidden->hidden) accumulate into one f32 tile,
    then a single bias add + tanh.  Activations are cast to the weight dtype
    (bf16 by default) in VMEM so the MXU runs at its native bf16 rate with f32
    accumulation.
    """
    wt = wih_ref.dtype
    acc = jnp.dot(x_ref[...].astype(wt), wih_ref[...],
                  preferred_element_type=jnp.float32)
    acc = acc + jnp.dot(h_ref[...].astype(wt), whh_ref[...],
                        preferred_element_type=jnp.float32)
    acc = acc + b_ref[...]                       # (1, TN) broadcasts over rows
    out_ref[...] = jnp.tanh(acc).astype(out_ref.dtype)


# --------------------------------------------------------------------------- #
# One-time parameter packing (call OUTSIDE any time-step loop)
# --------------------------------------------------------------------------- #
def pack_rnncell_params(w_ih, w_hh, b_ih, b_hh, *, weight_dtype=jnp.bfloat16):
    """Pack torch.nn.RNNCell params: w_ih (H, I), w_hh (H, H), b_* (H,).

    Returns
      w_ih_t: (Ip, Hp)  transposed, zero-padded, `weight_dtype`
      w_hh_t: (Hc, Hp)  transposed, zero-padded, `weight_dtype`
      bias:   (1,  Hp)  combined bias, f32 (added to the f32 accumulator)
    Contraction dims are rounded up to the sublane (8), the output dim to the
    lane width (128).  For realistic RNN sizes (I, H multiples of 128) no
    padding actually happens.
    """
    H, I = w_ih.shape
    Ip = _round_up(I, _SUBLANE)
    Hc = _round_up(H, _SUBLANE)
    Hp = _round_up(H, _LANE)
    w_ih_t = jnp.pad(w_ih, ((0, Hp - H), (0, Ip - I))).T.astype(weight_dtype)
    w_hh_t = jnp.pad(w_hh, ((0, Hp - H), (0, Hc - H))).T.astype(weight_dtype)
    bias = jnp.pad((b_ih + b_hh).astype(jnp.float32), (0, Hp - H)).reshape(1, Hp)
    return w_ih_t, w_hh_t, bias


# --------------------------------------------------------------------------- #
# Forward wrapper
# --------------------------------------------------------------------------- #
def rnncell_forward(x, h, w_ih_t, w_hh_t, bias, *, vmem_budget_bytes=40 << 20):
    """x: (B, I), h: (B, H), packed params -> new hidden (B, H).

    `vmem_budget_bytes` bounds the VMEM claimed by tiles; the default (40 MiB)
    is safe on v7x (64 MiB physical VMEM).  On v5e/v6e (128 MiB) pass a larger
    budget (e.g. 96 MiB) to keep bigger tiles / large fused weights resident.
    """
    B, I = x.shape
    Bh, H = h.shape
    assert Bh == B
    Ip, Hp = w_ih_t.shape
    Hc = w_hh_t.shape[0]
    assert Ip >= I and Hc >= H and bias.shape == (1, Hp)

    # Match the zero-padded contraction dims of the packed weights.  These are
    # no-ops for sublane/lane-aligned I, H (the common case).
    if Ip != I:
        x = jnp.pad(x, ((0, 0), (0, Ip - I)))
    if Hc != H:
        h = jnp.pad(h, ((0, 0), (0, Hc - H)))

    # ---- batch tiling: minimise padding waste, fill the MXU for large B ---- #
    if B <= 256:
        TB = _round_up(B, _SUBLANE)                       # single batch tile
    else:
        TB = min((256, 128), key=lambda t: (_round_up(B, t) - B, -t))
    Bp = _round_up(B, TB)
    if Bp != B:
        x = jnp.pad(x, ((0, Bp - B), (0, 0)))
        h = jnp.pad(h, ((0, Bp - B), (0, 0)))
    n_batch = Bp // TB

    # ---- hidden-dim tiling / VMEM accounting ---- #
    w_isize = w_ih_t.dtype.itemsize
    a_isize = x.dtype.itemsize

    def vmem_bytes(tn, wbufs):
        weights = (Ip + Hc) * tn * w_isize * wbufs        # weight tiles
        biasb = tn * 4 * wbufs                            # bias tile
        acts = 2 * TB * (Ip + Hc) * a_isize               # double-buffered x/h
        outs = 2 * TB * tn * a_isize                      # double-buffered out
        return weights + biasb + acts + outs

    if n_batch == 1 and Hp >= 256:
        # Tiny batch grid: split the hidden dim so both TensorCores (v7x
        # megacore) get work, and so huge weights need not be VMEM-resident.
        cands = [c for c in (128, 256, 512)
                 if Hp % c == 0 and Hp // c >= 2
                 and vmem_bytes(c, 2) <= vmem_budget_bytes]
        TN = max(cands) if cands else 128
    elif vmem_bytes(Hp, 1) <= vmem_budget_bytes:
        TN = Hp                                           # whole hidden dim resident
    else:
        TN = next((c for c in (512, 256, 128)
                   if Hp % c == 0 and vmem_bytes(c, 2) <= vmem_budget_bytes), 128)
    n_hid = Hp // TN
    resident = n_hid == 1          # weight/bias blocks constant over the grid

    wbufs = 1 if resident else 2
    vmem_limit = int(min(max(vmem_bytes(TN, wbufs) + (16 << 20), 32 << 20),
                         vmem_budget_bytes + (16 << 20)))

    def build(single_buffer_weights):
        wmode = ({"pipeline_mode": pl.Buffered(buffer_count=1)}
                 if single_buffer_weights else {})
        grid_spec = pl.GridSpec(
            # Hidden tiles on the OUTER axis so weight blocks are fetched once
            # per outer step (not re-fetched for every batch tile).
            grid=(n_hid, n_batch),
            in_specs=[
                pl.BlockSpec((TB, Ip), lambda j, i: (i, 0)),            # x
                pl.BlockSpec((TB, Hc), lambda j, i: (i, 0)),            # h
                pl.BlockSpec((Ip, TN), lambda j, i: (0, j), **wmode),   # W_ih^T
                pl.BlockSpec((Hc, TN), lambda j, i: (0, j), **wmode),   # W_hh^T
                pl.BlockSpec((1, TN), lambda j, i: (0, j), **wmode),    # bias
            ],
            out_specs=pl.BlockSpec((TB, TN), lambda j, i: (i, j)),
        )
        return pl.pallas_call(
            rnncell_kernel,
            out_shape=jax.ShapeDtypeStruct((Bp, Hp), x.dtype),
            grid_spec=grid_spec,
            compiler_params=pltpu.CompilerParams(
                dimension_semantics=("parallel", "parallel"),
                vmem_limit_bytes=vmem_limit,
            ),
        )

    try:
        out = build(resident)(x, h, w_ih_t, w_hh_t, bias)
    except Exception:
        if not resident:
            raise
        # pl.Buffered(1) single-buffering unavailable on this jax version /
        # backend: fall back to default double-buffering (identical results).
        out = build(False)(x, h, w_ih_t, w_hh_t, bias)

    # Strip batch / hidden padding once, at the call boundary.
    # TODO(synk): when stepping a sequence, keep the hidden state in its padded
    # (Bp, Hp) form between steps and move the time loop inside one pallas_call
    # (grid axis over T marked "arbitrary", state carried in VMEM scratch) so
    # the packed weights stay resident and per-step launch/HBM traffic vanishes.
    return out[:B, :H]


# --------------------------------------------------------------------------- #
# Demo / correctness check
# --------------------------------------------------------------------------- #
if __name__ == "__main__":
    batch_size = 1
    input_size = 4
    hidden_size = 4

    key = jax.random.PRNGKey(0)
    k_x, k_h, k_wih, k_whh, k_bih, k_bhh = jax.random.split(key, 6)

    # torch.nn.RNNCell-style init: uniform(-1/sqrt(H), 1/sqrt(H)).
    bound = 1.0 / jnp.sqrt(jnp.float32(hidden_size))
    w_ih = jax.random.uniform(k_wih, (hidden_size, input_size),
                              jnp.float32, -bound, bound)
    w_hh = jax.random.uniform(k_whh, (hidden_size, hidden_size),
                              jnp.float32, -bound, bound)
    b_ih = jax.random.uniform(k_bih, (hidden_size,), jnp.float32, -bound, bound)
    b_hh = jax.random.uniform(k_bhh, (hidden_size,), jnp.float32, -bound, bound)

    x = jax.random.normal(k_x, (batch_size, input_size), jnp.float32)
    h0 = jax.random.normal(k_h, (batch_size, hidden_size), jnp.float32)

    # Pure-JAX reference of the RNNCell forward.
    ref = jnp.tanh(x @ w_ih.T + b_ih + h0 @ w_hh.T + b_hh)

    # Default (bf16-weight) path: MXU-native dtype, f32 accumulation.
    params_bf16 = pack_rnncell_params(w_ih, w_hh, b_ih, b_hh)
    h1 = jax.block_until_ready(rnncell_forward(x, h0, *params_bf16))
    assert h1.shape == (batch_size, hidden_size)
    assert jnp.allclose(h1, ref, atol=2e-2, rtol=2e-2), "bf16 path mismatch vs reference"

    # Full-precision packing path for a tight numerical check of the kernel.
    params_f32 = pack_rnncell_params(w_ih, w_hh, b_ih, b_hh,
                                     weight_dtype=jnp.float32)
    h1_f32 = jax.block_until_ready(rnncell_forward(x, h0, *params_f32))
    assert jnp.allclose(h1_f32, ref, atol=1e-5, rtol=1e-5), "f32 path mismatch vs reference"

    print("KERNEL_OK")
</pallas_src>

<mosaic_0001>
module attributes {stable_mosaic.version = 11 : i64} {
  func.func @rnncell_kernel(%arg0: i32, %arg1: i32, %arg2: memref<8x8xf32, #tpu.memory_space<vmem>>, %arg3: memref<8x8xf32, #tpu.memory_space<vmem>>, %arg4: memref<8x128xbf16, #tpu.memory_space<vmem>>, %arg5: memref<8x128xbf16, #tpu.memory_space<vmem>>, %arg6: memref<1x128xf32, #tpu.memory_space<vmem>>, %arg7: memref<8x128xf32, #tpu.memory_space<vmem>>) attributes {dimension_semantics = [#tpu.dimension_semantics<parallel>, #tpu.dimension_semantics<parallel>], iteration_bounds = array<i64: 1, 1>, scalar_prefetch = 0 : i64, scratch_operands = 0 : i64, tpu.core_type = #tpu.core_type<tc>, window_params = [{transform_indices = @transform_0, window_bounds = array<i64: 8, 8>}, {transform_indices = @transform_1, window_bounds = array<i64: 8, 8>}, {pipeline_mode = #tpu.pipeline_mode<synchronous>, transform_indices = @transform_2, window_bounds = array<i64: 8, 128>}, {pipeline_mode = #tpu.pipeline_mode<synchronous>, transform_indices = @transform_3, window_bounds = array<i64: 8, 128>}, {pipeline_mode = #tpu.pipeline_mode<synchronous>, transform_indices = @transform_4, window_bounds = array<i64: 1, 128>}, {transform_indices = @transform_5, window_bounds = array<i64: 8, 128>}]} {
    %c0 = arith.constant 0 : index
    %c0_0 = arith.constant 0 : index
    %0 = vector.load %arg2[%c0, %c0_0] : memref<8x8xf32, #tpu.memory_space<vmem>>, vector<8x8xf32>
    %1 = arith.truncf %0 : vector<8x8xf32> to vector<8x8xbf16>
    %c0_1 = arith.constant 0 : index
    %c0_2 = arith.constant 0 : index
    %2 = vector.load %arg4[%c0_1, %c0_2] : memref<8x128xbf16, #tpu.memory_space<vmem>>, vector<8x128xbf16>
    %cst = arith.constant dense<0.000000e+00> : vector<8x128xf32>
    %3 = tpu.matmul %1, %2, %cst {dimension_numbers = #tpu.dot_dimension_numbers<[1], [0], [0], [1], [0, 0, 1, 1], [], []>} : vector<8x8xbf16>, vector<8x128xbf16>, vector<8x128xf32> -> vector<8x128xf32>
    %c0_3 = arith.constant 0 : index
    %c0_4 = arith.constant 0 : index
    %4 = vector.load %arg3[%c0_3, %c0_4] : memref<8x8xf32, #tpu.memory_space<vmem>>, vector<8x8xf32>
    %5 = arith.truncf %4 : vector<8x8xf32> to vector<8x8xbf16>
    %c0_5 = arith.constant 0 : index
    %c0_6 = arith.constant 0 : index
    %6 = vector.load %arg5[%c0_5, %c0_6] : memref<8x128xbf16, #tpu.memory_space<vmem>>, vector<8x128xbf16>
    %cst_7 = arith.constant dense<0.000000e+00> : vector<8x128xf32>
    %7 = tpu.matmul %5, %6, %cst_7 {dimension_numbers = #tpu.dot_dimension_numbers<[1], [0], [0], [1], [0, 0, 1, 1], [], []>} : vector<8x8xbf16>, vector<8x128xbf16>, vector<8x128xf32> -> vector<8x128xf32>
    %8 = arith.addf %3, %7 : vector<8x128xf32>
    %c0_8 = arith.constant 0 : index
    %c0_9 = arith.constant 0 : index
    %9 = vector.load %arg6[%c0_8, %c0_9] : memref<1x128xf32, #tpu.memory_space<vmem>>, vector<1x128xf32>
    %10 = vector.broadcast %9 : vector<1x128xf32> to vector<8x128xf32>
    %11 = arith.addf %8, %10 : vector<8x128xf32>
    %12 = math.tanh %11 : vector<8x128xf32>
    %c0_10 = arith.constant 0 : index
    %c0_11 = arith.constant 0 : index
    %13 = vector.load %arg7[%c0_10, %c0_11] : memref<8x128xf32, #tpu.memory_space<vmem>>, vector<8x128xf32>
    tpu.vector_store %arg7[%c0_10, %c0_11], %12 {strides = array<i32>} : memref<8x128xf32, #tpu.memory_space<vmem>>, vector<8x128xf32>,
    return
  }
  func.func @transform_0(%arg0: i32, %arg1: i32) -> (i32, i32) {
    %c0_i32 = arith.constant 0 : i32
    %c0_i32_0 = arith.constant 0 : i32
    return %arg1, %c0_i32 : i32, i32
  }
  func.func @transform_1(%arg0: i32, %arg1: i32) -> (i32, i32) {
    %c0_i32 = arith.constant 0 : i32
    %c0_i32_0 = arith.constant 0 : i32
    return %arg1, %c0_i32 : i32, i32
  }
  func.func @transform_2(%arg0: i32, %arg1: i32) -> (i32, i32) {
    %c0_i32 = arith.constant 0 : i32
    %c0_i32_0 = arith.constant 0 : i32
    return %c0_i32, %arg0 : i32, i32
  }
  func.func @transform_3(%arg0: i32, %arg1: i32) -> (i32, i32) {
    %c0_i32 = arith.constant 0 : i32
    %c0_i32_0 = arith.constant 0 : i32
    return %c0_i32, %arg0 : i32, i32
  }
  func.func @transform_4(%arg0: i32, %arg1: i32) -> (i32, i32) {
    %c0_i32 = arith.constant 0 : i32
    %c0_i32_0 = arith.constant 0 : i32
    return %c0_i32, %arg0 : i32, i32
  }
  func.func @transform_5(%arg0: i32, %arg1: i32) -> (i32, i32) {
    %c0_i32 = arith.constant 0 : i32
    return %arg1, %arg0 : i32, i32
  }
}

module attributes {stable_mosaic.version = 11 : i64} {
  func.func @rnncell_kernel(%arg0: i32, %arg1: i32, %arg2: memref<8x8xf32, #tpu.memory_space<vmem>>, %arg3: memref<8x8xf32, #tpu.memory_space<vmem>>, %arg4: memref<8x128xbf16, #tpu.memory_space<vmem>>, %arg5: memref<8x128xbf16, #tpu.memory_space<vmem>>, %arg6: memref<1x128xf32, #tpu.memory_space<vmem>>, %arg7: memref<8x128xf32, #tpu.memory_space<vmem>>) attributes {dimension_semantics = [#tpu.dimension_semantics<parallel>, #tpu.dimension_semantics<parallel>], iteration_bounds = array<i64: 1, 1>, scalar_prefetch = 0 : i64, scratch_operands = 0 : i64, tpu.core_type = #tpu.core_type<tc>, window_params = [{transform_indices = @transform_0, window_bounds = array<i64: 8, 8>}, {transform_indices = @transform_1, window_bounds = array<i64: 8, 8>}, {transform_indices = @transform_2, window_bounds = array<i64: 8, 128>}, {transform_indices = @transform_3, window_bounds = array<i64: 8, 128>}, {transform_indices = @transform_4, window_bounds = array<i64: 1, 128>}, {transform_indices = @transform_5, window_bounds = array<i64: 8, 128>}]} {
    %c0 = arith.constant 0 : index
    %c0_0 = arith.constant 0 : index
    %0 = vector.load %arg2[%c0, %c0_0] : memref<8x8xf32, #tpu.memory_space<vmem>>, vector<8x8xf32>
    %1 = arith.truncf %0 : vector<8x8xf32> to vector<8x8xbf16>
    %c0_1 = arith.constant 0 : index
    %c0_2 = arith.constant 0 : index
    %2 = vector.load %arg4[%c0_1, %c0_2] : memref<8x128xbf16, #tpu.memory_space<vmem>>, vector<8x128xbf16>
    %cst = arith.constant dense<0.000000e+00> : vector<8x128xf32>
    %3 = tpu.matmul %1, %2, %cst {dimension_numbers = #tpu.dot_dimension_numbers<[1], [0], [0], [1], [0, 0, 1, 1], [], []>} : vector<8x8xbf16>, vector<8x128xbf16>, vector<8x128xf32> -> vector<8x128xf32>
    %c0_3 = arith.constant 0 : index
    %c0_4 = arith.constant 0 : index
    %4 = vector.load %arg3[%c0_3, %c0_4] : memref<8x8xf32, #tpu.memory_space<vmem>>, vector<8x8xf32>
    %5 = arith.truncf %4 : vector<8x8xf32> to vector<8x8xbf16>
    %c0_5 = arith.constant 0 : index
    %c0_6 = arith.constant 0 : index
    %6 = vector.load %arg5[%c0_5, %c0_6] : memref<8x128xbf16, #tpu.memory_space<vmem>>, vector<8x128xbf16>
    %cst_7 = arith.constant dense<0.000000e+00> : vector<8x128xf32>
    %7 = tpu.matmul %5, %6, %cst_7 {dimension_numbers = #tpu.dot_dimension_numbers<[1], [0], [0], [1], [0, 0, 1, 1], [], []>} : vector<8x8xbf16>, vector<8x128xbf16>, vector<8x128xf32> -> vector<8x128xf32>
    %8 = arith.addf %3, %7 : vector<8x128xf32>
    %c0_8 = arith.constant 0 : index
    %c0_9 = arith.constant 0 : index
    %9 = vector.load %arg6[%c0_8, %c0_9] : memref<1x128xf32, #tpu.memory_space<vmem>>, vector<1x128xf32>
    %10 = vector.broadcast %9 : vector<1x128xf32> to vector<8x128xf32>
    %11 = arith.addf %8, %10 : vector<8x128xf32>
    %12 = math.tanh %11 : vector<8x128xf32>
    %c0_10 = arith.constant 0 : index
    %c0_11 = arith.constant 0 : index
    %13 = vector.load %arg7[%c0_10, %c0_11] : memref<8x128xf32, #tpu.memory_space<vmem>>, vector<8x128xf32>
    tpu.vector_store %arg7[%c0_10, %c0_11], %12 {strides = array<i32>} : memref<8x128xf32, #tpu.memory_space<vmem>>, vector<8x128xf32>,
    return
  }
  func.func @transform_0(%arg0: i32, %arg1: i32) -> (i32, i32) {
    %c0_i32 = arith.constant 0 : i32
    %c0_i32_0 = arith.constant 0 : i32
    return %arg1, %c0_i32 : i32, i32
  }
  func.func @transform_1(%arg0: i32, %arg1: i32) -> (i32, i32) {
    %c0_i32 = arith.constant 0 : i32
    %c0_i32_0 = arith.constant 0 : i32
    return %arg1, %c0_i32 : i32, i32
  }
  func.func @transform_2(%arg0: i32, %arg1: i32) -> (i32, i32) {
    %c0_i32 = arith.constant 0 : i32
    %c0_i32_0 = arith.constant 0 : i32
    return %c0_i32, %arg0 : i32, i32
  }
  func.func @transform_3(%arg0: i32, %arg1: i32) -> (i32, i32) {
    %c0_i32 = arith.constant 0 : i32
    %c0_i32_0 = arith.constant 0 : i32
    return %c0_i32, %arg0 : i32, i32
  }
  func.func @transform_4(%arg0: i32, %arg1: i32) -> (i32, i32) {
    %c0_i32 = arith.constant 0 : i32
    %c0_i32_0 = arith.constant 0 : i32
    return %c0_i32, %arg0 : i32, i32
  }
  func.func @transform_5(%arg0: i32, %arg1: i32) -> (i32, i32) {
    %c0_i32 = arith.constant 0 : i32
    return %arg1, %arg0 : i32, i32
  }
}

</mosaic_0001>

<bundles_post_ra>
// kernel: tpu_custom_call.1
= control target key start
LH: loop header
LB: loop body
LE: loop exit
PB: predicated region body
PF: predicated region fallthrough
CT: control target
= control target key end

     0   :  { %10 = vsyncpa [#allocation3], 0  ;;  %s350_s0 = inlined_call_operand.hbm [shape: f32[8,8], index: 0, kind: input, shape index: {}]   ;;  %s351_s1 = inlined_call_operand.hbm [shape: f32[8,8], index: 1, kind: input, shape index: {}]   ;;  %s352_s2 = inlined_call_operand.vmem [shape: bf16[8,128], index: 2, kind: input, shape index: {}]   ;;  %s353_s3 = inlined_call_operand.vmem [shape: bf16[8,128], index: 3, kind: input, shape index: {}]   ;;  %s354_s4 = inlined_call_operand.vmem [shape: f32[1,128], index: 4, kind: input, shape index: {}]   ;;  %s355_s5 = inlined_call_operand.hbm [shape: f32[8,128], index: 5, kind: output, shape index: {}]  }
   0x1   :  { %11 = vsyncpa [#allocation6], 0 }
   0x2   :  { %12 = vsyncpa [#allocation4], 0  ;;  %s270_s18 = smov [#allocation2]   ;;  %s271_s20 = smov [#allocation5]  }
   0x3   :  { %s19_s19 = sshll.u32 %s270_s18, 4  ;;  %s29_s21 = sshll.u32 %s271_s20, 4  ;;  %s20_s19 = int_to_ptr.vmem [resolvable:$true] %s19_s19  ;;  %s30_s21 = int_to_ptr.vmem [resolvable:$true] %s29_s21 }
   0x4   :  { %s198_s24 = scalar_lea.hbm %s350_s0, 128 }
   0x5   :  { %p199_p0 = scmp.ne.s32.totalorder %s350_s0, %s198_s24  ;;  %p202_p1 = scmp.lt.u32.totalorder %s198_s24, %s350_s0 }
   0x7   :  { %p204_p2 = pnand %p202_p1, %p199_p0 }
   0x9   :  { %207 = shalt.err (!%p204_p2)
}
   0xa   :  { %s208_s29 = scalar_lea.vmem %s20_s19, 128  ;;  %p213_p4 = scmp.lt.s32.totalorder %s20_s19, %s20_s19 }
   0xb   :  { %p209_p3 = scmp.ne.s32.totalorder %s20_s19, %s208_s29  ;;  %p214_p5 = scmp.lt.s32.totalorder %s208_s29, %s208_s29 }
   0xd   :  { %p215_p6 = por %p214_p5, %p213_p4 }
   0xf   :  { %p216_p7 = pnand %p215_p6, %p209_p3 }
  0x11   :  { %219 = shalt.err (!%p216_p7)
}
  0x12   :  { %22 = dma.hbm_to_vmem [thread:$0]  %s350_s0, 128, %s20_s19, [#allocation3]  }
  0x13   :  { %s220_s9 = scalar_lea.hbm %s351_s1, 128 }
  0x14   :  { %p221_p8 = scmp.ne.s32.totalorder %s351_s1, %s220_s9  ;;  %p224_p9 = scmp.lt.u32.totalorder %s220_s9, %s351_s1 }
  0x16   :  { %p226_p10 = pnand %p224_p9, %p221_p8 }
  0x18   :  { %229 = shalt.err (!%p226_p10)
}
  0x19   :  { %s230_s14 = scalar_lea.vmem %s30_s21, 128  ;;  %p235_p12 = scmp.lt.s32.totalorder %s30_s21, %s30_s21 }
  0x1a   :  { %p231_p11 = scmp.ne.s32.totalorder %s30_s21, %s230_s14  ;;  %p236_p13 = scmp.lt.s32.totalorder %s230_s14, %s230_s14 }
  0x1c   :  { %p237_p0 = por %p236_p13, %p235_p12 }
  0x1e   :  { %p238_p1 = pnand %p237_p0, %p231_p11 }
  0x20   :  { %241 = shalt.err (!%p238_p1)
}
  0x21   :  { %32 = dma.hbm_to_vmem [thread:$0]  %s351_s1, 128, %s30_s21, [#allocation6]  }
  0x22   :  { %264 = dma.done.wait [#allocation3], 128  }
  0x23   :  { %265 = vsyncadd [#allocation3], 4294967168 }
  0x24   :  { %266 = dma.done.wait [#allocation6], 128  }
  0x25   :  { %267 = vsyncadd [#allocation6], 4294967168  ;;  %v272_v0 = vmov 0.0   ;;  %vm273_vm0 = vmmov 0   ;;  %vm56_vm1 = vcmask 1043456   ;;  %v49_v3 = vld [vmem:[#allocation5] sm:$0xff] }
  0x26   :  { %179 = vmatprep.subr.bf16.mxu0 %v272_v0  ;;  %185 = vmatprep.subr.bf16.mxu1 %v272_v0  ;;  %v51_v1 = vld [vmem:[%s353_s3] sm:$0xf]  ;;  %v50_v6 = vpack.c.bf16 %v49_v3, %v49_v3  ;;  %vm52_vm2 = vcmask 64512  }
  0x27   :  { %181 = vmatprep.mubr.msk.bf16.mxu0 %vm273_vm0, %v272_v0  ;;  %187 = vmatprep.mubr.msk.bf16.mxu1 %vm273_vm0, %v272_v0  ;;  %v48_v2 = vld [vmem:[%s352_s2] sm:$0xf]  ;;  %v58_v4 = vsel %vm56_vm1, %v51_v1, 0  ;;  %s274_s2 = smov [#allocation7]  }
  0x28   :  { %v104_v5 = vsel %vm56_vm1, %v48_v2, 0  ;;  %v46_v7 = vld [vmem:[#allocation2] sm:$0xff]  ;;  %180 = vmatpush3.bf16.msra.mxu0 %v58_v4  ;;  %s162_s3 = sshll.u32 %s274_s2, 4  ;;  %s163_s3 = int_to_ptr.vmem [resolvable:$true] %s162_s3 }
  0x29   :  { %186 = vmatpush3.bf16.msra.mxu1 %v104_v5  ;;  %v47_v8 = vpack.c.bf16 %v46_v7, %v46_v7  ;;  %v174_v11 = vld [vmem:[%s354_s4] ss:$0 sm:$0xff]  ;;  %s242_s21 = scalar_lea.vmem %s163_s3, 128  ;;  %p247_p3 = scmp.lt.s32.totalorder %s163_s3, %s163_s3 }
  0x2a   :  { %p243_p2 = scmp.ne.s32.totalorder %s163_s3, %s242_s21  ;;  %p248_p4 = scmp.lt.s32.totalorder %s242_s21, %s242_s21 }
  0x2b   :  { %182 = vmatmul.mubr.msk.bf16.vlgmr.msra.gmra.mrb[0].mxu0 %vm52_vm2, %v50_v6 }
  0x2c   :  { %188 = vmatmul.mubr.msk.bf16.vlgmr.msra.gmra.mrb[0].mxu1 %vm52_vm2, %v47_v8  ;;  %p249_p5 = por %p248_p4, %p247_p3 }
  0x2e   :  { %p250_p6 = pnand %p249_p5, %p243_p2 }
  0xfe   :  { %v94_v9 = vpop.f32.mrb[0].mxu0 }
  0xff   :  { %v140_v10 = vpop.f32.mrb[0].mxu1  ;;  %v183_v13 = vpop.f32.mrb[1].mxu0 }
 0x100   :  { %v141_v12 = vadd.f32 %v140_v10, %v94_v9  ;;  %v189_v14 = vpop.f32.mrb[1].mxu1  ;;  %v97_v15 = vpop.f32.mrb[2].mxu0 }
 0x101   :  { %v143_v16 = vpop.f32.mrb[2].mxu1  ;;  %v184_v18 = vpop.f32.mrb[3].mxu0 }
 0x102   :  { %v153_v17 = vadd.f32 %v174_v11, %v141_v12  ;;  %v190_v19 = vpop.f32.mrb[3].mxu1 }
 0x104   :  { %196 = vtanh.f32 %v153_v17 }
 0x10e   :  { %v197_v20 = vpop.eup %196 }
 0x10f   :  { %155 = vst [vmem:[#allocation7] sm:$0xff] %v197_v20 }
 0x110   :  { %253 = shalt.err (!%p250_p6)
}
 0x111   :  { %s254_s23 = scalar_lea.hbm %s355_s5, 128 }
 0x112   :  { %p255_p7 = scmp.ne.s32.totalorder %s355_s5, %s254_s23  ;;  %p258_p8 = scmp.lt.u32.totalorder %s254_s23, %s355_s5 }
 0x114   :  { %p260_p9 = pnand %p258_p8, %p255_p7 }
 0x116   :  { %263 = shalt.err (!%p260_p9)
}
 0x117   :  { %165 = dma.vmem_to_hbm [thread:$0]  %s163_s3, 128, %s355_s5, [#allocation4]  }
 0x118   :  { %268 = dma.done.wait [#allocation4], 128  }
 0x119   :  { %269 = vsyncadd [#allocation4], 4294967168 }
 0x11a   :  { %169 = vsyncpa [#allocation3], 1 }
 0x11b   :  { %170 = vsyncpa [#allocation6], 1 }
 0x11c   :  { %171 = vsyncpa [#allocation4], 1 }

// kernel: tpu_custom_call.1
= control target key start
LH: loop header
LB: loop body
LE: loop exit
PB: predicated region body
PF: predicated region fallthrough
CT: control target
= control target key end

     0   :  { %10 = vsyncpa [#allocation3], 0  ;;  %s350_s0 = inlined_call_operand.hbm [shape: f32[8,8], index: 0, kind: input, shape index: {}]   ;;  %s351_s1 = inlined_call_operand.hbm [shape: f32[8,8], index: 1, kind: input, shape index: {}]   ;;  %s352_s2 = inlined_call_operand.vmem [shape: bf16[8,128], index: 2, kind: input, shape index: {}]   ;;  %s353_s3 = inlined_call_operand.vmem [shape: bf16[8,128], index: 3, kind: input, shape index: {}]   ;;  %s354_s4 = inlined_call_operand.vmem [shape: f32[1,128], index: 4, kind: input, shape index: {}]   ;;  %s355_s5 = inlined_call_operand.hbm [shape: f32[8,128], index: 5, kind: output, shape index: {}]  }
   0x1   :  { %11 = vsyncpa [#allocation6], 0 }
   0x2   :  { %12 = vsyncpa [#allocation4], 0  ;;  %s270_s18 = smov [#allocation2]   ;;  %s271_s20 = smov [#allocation5]  }
   0x3   :  { %s19_s19 = sshll.u32 %s270_s18, 4  ;;  %s29_s21 = sshll.u32 %s271_s20, 4  ;;  %s20_s19 = int_to_ptr.vmem [resolvable:$true] %s19_s19  ;;  %s30_s21 = int_to_ptr.vmem [resolvable:$true] %s29_s21 }
   0x4   :  { %s198_s24 = scalar_lea.hbm %s350_s0, 128 }
   0x5   :  { %p199_p0 = scmp.ne.s32.totalorder %s350_s0, %s198_s24  ;;  %p202_p1 = scmp.lt.u32.totalorder %s198_s24, %s350_s0 }
   0x7   :  { %p204_p2 = pnand %p202_p1, %p199_p0 }
   0x9   :  { %207 = shalt.err (!%p204_p2)
}
   0xa   :  { %s208_s29 = scalar_lea.vmem %s20_s19, 128  ;;  %p213_p4 = scmp.lt.s32.totalorder %s20_s19, %s20_s19 }
   0xb   :  { %p209_p3 = scmp.ne.s32.totalorder %s20_s19, %s208_s29  ;;  %p214_p5 = scmp.lt.s32.totalorder %s208_s29, %s208_s29 }
   0xd   :  { %p215_p6 = por %p214_p5, %p213_p4 }
   0xf   :  { %p216_p7 = pnand %p215_p6, %p209_p3 }
  0x11   :  { %219 = shalt.err (!%p216_p7)
}
  0x12   :  { %22 = dma.hbm_to_vmem [thread:$0]  %s350_s0, 128, %s20_s19, [#allocation3]  }
  0x13   :  { %s220_s9 = scalar_lea.hbm %s351_s1, 128 }
  0x14   :  { %p221_p8 = scmp.ne.s32.totalorder %s351_s1, %s220_s9  ;;  %p224_p9 = scmp.lt.u32.totalorder %s220_s9, %s351_s1 }
  0x16   :  { %p226_p10 = pnand %p224_p9, %p221_p8 }
  0x18   :  { %229 = shalt.err (!%p226_p10)
}
  0x19   :  { %s230_s14 = scalar_lea.vmem %s30_s21, 128  ;;  %p235_p12 = scmp.lt.s32.totalorder %s30_s21, %s30_s21 }
  0x1a   :  { %p231_p11 = scmp.ne.s32.totalorder %s30_s21, %s230_s14  ;;  %p236_p13 = scmp.lt.s32.totalorder %s230_s14, %s230_s14 }
  0x1c   :  { %p237_p0 = por %p236_p13, %p235_p12 }
  0x1e   :  { %p238_p1 = pnand %p237_p0, %p231_p11 }
  0x20   :  { %241 = shalt.err (!%p238_p1)
}
  0x21   :  { %32 = dma.hbm_to_vmem [thread:$0]  %s351_s1, 128, %s30_s21, [#allocation6]  }
  0x22   :  { %264 = dma.done.wait [#allocation3], 128  }
  0x23   :  { %265 = vsyncadd [#allocation3], 4294967168 }
  0x24   :  { %266 = dma.done.wait [#allocation6], 128  }
  0x25   :  { %267 = vsyncadd [#allocation6], 4294967168  ;;  %v272_v0 = vmov 0.0   ;;  %vm273_vm0 = vmmov 0   ;;  %vm56_vm1 = vcmask 1043456   ;;  %v49_v3 = vld [vmem:[#allocation5] sm:$0xff] }
  0x26   :  { %179 = vmatprep.subr.bf16.mxu0 %v272_v0  ;;  %185 = vmatprep.subr.bf16.mxu1 %v272_v0  ;;  %v51_v1 = vld [vmem:[%s353_s3] sm:$0xf]  ;;  %v50_v6 = vpack.c.bf16 %v49_v3, %v49_v3  ;;  %vm52_vm2 = vcmask 64512  }
  0x27   :  { %181 = vmatprep.mubr.msk.bf16.mxu0 %vm273_vm0, %v272_v0  ;;  %187 = vmatprep.mubr.msk.bf16.mxu1 %vm273_vm0, %v272_v0  ;;  %v48_v2 = vld [vmem:[%s352_s2] sm:$0xf]  ;;  %v58_v4 = vsel %vm56_vm1, %v51_v1, 0  ;;  %s274_s2 = smov [#allocation7]  }
  0x28   :  { %v104_v5 = vsel %vm56_vm1, %v48_v2, 0  ;;  %v46_v7 = vld [vmem:[#allocation2] sm:$0xff]  ;;  %180 = vmatpush3.bf16.msra.mxu0 %v58_v4  ;;  %s162_s3 = sshll.u32 %s274_s2, 4  ;;  %s163_s3 = int_to_ptr.vmem [resolvable:$true] %s162_s3 }
  0x29   :  { %186 = vmatpush3.bf16.msra.mxu1 %v104_v5  ;;  %v47_v8 = vpack.c.bf16 %v46_v7, %v46_v7  ;;  %v174_v11 = vld [vmem:[%s354_s4] ss:$0 sm:$0xff]  ;;  %s242_s21 = scalar_lea.vmem %s163_s3, 128  ;;  %p247_p3 = scmp.lt.s32.totalorder %s163_s3, %s163_s3 }
  0x2a   :  { %p243_p2 = scmp.ne.s32.totalorder %s163_s3, %s242_s21  ;;  %p248_p4 = scmp.lt.s32.totalorder %s242_s21, %s242_s21 }
  0x2b   :  { %182 = vmatmul.mubr.msk.bf16.vlgmr.msra.gmra.mrb[0].mxu0 %vm52_vm2, %v50_v6 }
  0x2c   :  { %188 = vmatmul.mubr.msk.bf16.vlgmr.msra.gmra.mrb[0].mxu1 %vm52_vm2, %v47_v8  ;;  %p249_p5 = por %p248_p4, %p247_p3 }
  0x2e   :  { %p250_p6 = pnand %p249_p5, %p243_p2 }
  0xfe   :  { %v94_v9 = vpop.f32.mrb[0].mxu0 }
  0xff   :  { %v140_v10 = vpop.f32.mrb[0].mxu1  ;;  %v183_v13 = vpop.f32.mrb[1].mxu0 }
 0x100   :  { %v141_v12 = vadd.f32 %v140_v10, %v94_v9  ;;  %v189_v14 = vpop.f32.mrb[1].mxu1  ;;  %v97_v15 = vpop.f32.mrb[2].mxu0 }
 0x101   :  { %v143_v16 = vpop.f32.mrb[2].mxu1  ;;  %v184_v18 = vpop.f32.mrb[3].mxu0 }
 0x102   :  { %v153_v17 = vadd.f32 %v174_v11, %v141_v12  ;;  %v190_v19 = vpop.f32.mrb[3].mxu1 }
 0x104   :  { %196 = vtanh.f32 %v153_v17 }
 0x10e   :  { %v197_v20 = vpop.eup %196 }
 0x10f   :  { %155 = vst [vmem:[#allocation7] sm:$0xff] %v197_v20 }
 0x110   :  { %253 = shalt.err (!%p250_p6)
}
 0x111   :  { %s254_s23 = scalar_lea.hbm %s355_s5, 128 }
 0x112   :  { %p255_p7 = scmp.ne.s32.totalorder %s355_s5, %s254_s23  ;;  %p258_p8 = scmp.lt.u32.totalorder %s254_s23, %s355_s5 }
 0x114   :  { %p260_p9 = pnand %p258_p8, %p255_p7 }
 0x116   :  { %263 = shalt.err (!%p260_p9)
}
 0x117   :  { %165 = dma.vmem_to_hbm [thread:$0]  %s163_s3, 128, %s355_s5, [#allocation4]  }
 0x118   :  { %268 = dma.done.wait [#allocation4], 128  }
 0x119   :  { %269 = vsyncadd [#allocation4], 4294967168 }
 0x11a   :  { %169 = vsyncpa [#allocation3], 1 }
 0x11b   :  { %170 = vsyncpa [#allocation6], 1 }
 0x11c   :  { %171 = vsyncpa [#allocation4], 1 }

</bundles_post_ra>
